<compile_context>
chip_gen: v6e
topology: v6e:2x2x1
jax: 0.10.0
libtpu: 0.0.40
codegen_flags: <defaults>
</compile_context>

<pallas_src>
import jax
import jax.numpy as jnp
from jax.experimental import pallas as pl
from jax.experimental.pallas import tpu as pltpu

NUM_CLASSES = 2
_NEG_BIG = -1e9                # pad logit for class 1 -> p1(pad) == 0 exactly
_LANES = 128
_PAIRS_PER_ROW = _LANES // 2   # 64 samples per 128-lane slab row


def _cdiv(a, b):
    return (a + b - 1) // b


def _round_up(a, b):
    return _cdiv(a, b) * b


def _sum2d(x):
    # Staged (sublane then lane) full reduction -> (1, 1); XLU work only at finalize.
    return jnp.sum(jnp.sum(x, axis=0, keepdims=True), axis=1, keepdims=True)


def _f1_stats_kernel(logit_ref, label_ref, part_ref, sgn_ref, acc_p, acc_pt, acc_y):
    """Accumulate sum(p1), sum(p1*y), sum(y) over this core-split's slice of the batch."""
    i = pl.program_id(1)                       # reduction ("arbitrary") axis

    @pl.when(i == 0)
    def _init():
        lane = jax.lax.broadcasted_iota(jnp.int32, acc_p.shape, 1)
        # +0.5 on odd lanes (class-1 slot), -0.5 on even lanes (class-0 slot).
        sgn_ref[...] = jnp.where((lane & 1) == 1, 0.5, -0.5).astype(jnp.float32)
        acc_p[...] = jnp.zeros_like(acc_p)
        acc_pt[...] = jnp.zeros_like(acc_pt)
        acc_y[...] = jnp.zeros_like(acc_y)

    # (TR, 128) slab of interleaved (z0, z1) pairs; upcast in-register (bf16 ok).
    x = logit_ref[...].astype(jnp.float32)
    xr = pltpu.roll(x, 1, 1)                   # partner logit on one lane parity (XLU)
    t = jnp.tanh(0.5 * (x - xr))               # EUP; tanh is odd, sign fixed below
    # 2-class softmax == sigmoid(z1 - z0).  At whichever lane parity the roll paired
    # within the sample, p1 below equals sigmoid(z1 - z0); other lanes hold bounded junk.
    p1 = 0.5 + sgn_ref[...] * t
    y = label_ref[...].astype(jnp.float32)     # label y_j replicated on both lanes of pair j

    # Pure elementwise accumulation; cross-lane reductions deferred to finalize.
    acc_p[...] += p1
    acc_pt[...] += p1 * y
    acc_y[...] += y

    @pl.when(i == pl.num_programs(1) - 1)
    def _finalize():
        lane = jax.lax.broadcasted_iota(jnp.int32, acc_p.shape, 1)
        lane_r = pltpu.roll(lane, 1, 1)
        # A lane is "valid" iff the roll paired it with the other lane of its own
        # 2-lane sample pair — exactly one parity, independent of roll direction.
        valid = (lane - (lane & 1)) == (lane_r - (lane_r & 1))
        s1 = _sum2d(jnp.where(valid, acc_p[...], 0.0))   # sum_j p1_j           (1, 1)
        t1 = _sum2d(jnp.where(valid, acc_pt[...], 0.0))  # sum_j p1_j * y_j     (1, 1)
        l1 = _sum2d(jnp.where(valid, acc_y[...], 0.0))   # number of class-1 labels
        sub8 = jax.lax.broadcasted_iota(jnp.int32, (8, _LANES), 0)
        lan8 = jax.lax.broadcasted_iota(jnp.int32, (8, _LANES), 1)
        vals = jnp.zeros((8, _LANES), jnp.float32)
        vals = jnp.where((sub8 == 0) & (lan8 == 0), s1, vals)
        vals = jnp.where((sub8 == 0) & (lan8 == 1), t1, vals)
        vals = jnp.where((sub8 == 0) & (lan8 == 2), l1, vals)
        part_ref[...] = vals


def f1_loss(y_pred, y_true, *, epsilon=1e-7, block_samples=32768, num_core_splits=2):
    """F1 loss (1 - mean F1 over 2 classes) of (N, 2) logits vs (N,) {0,1} labels."""
    assert y_pred.ndim == 2 and y_pred.shape[1] == NUM_CLASSES
    assert y_true.ndim == 1 and y_true.shape[0] == y_pred.shape[0]
    n = y_pred.shape[0]

    # --- tiling: samples/step multiple of 2048 so the sublane block dim (bs//64) is a
    # multiple of 32 (f32 / bf16 / int8 tiling all satisfied); capped so double-buffered
    # tiles + 4 accumulator/scratch slabs stay far below every chip's VMEM limit.
    bs = max(2048, min(int(block_samples), 262144) // 2048 * 2048)
    bs = min(bs, _round_up(n, 2048))
    n_blocks = _cdiv(n, bs)
    splits = num_core_splits if n_blocks >= num_core_splits else 1
    n_blocks = _round_up(n_blocks, splits)
    n_pad = n_blocks * bs
    steps = n_blocks // splits
    tr = bs // _PAIRS_PER_ROW                  # sublane rows per block

    # --- lane-dense input slabs (free reshapes; no wrapper-side dtype upcast) ---
    logits = y_pred                            # native dtype (bf16 stays bf16)
    labels = y_true.astype(jnp.int8)           # 1-byte labels
    if n_pad != n:
        pad_row = jnp.asarray([[0.0, _NEG_BIG]], dtype=logits.dtype)
        logits = jnp.concatenate([logits, jnp.tile(pad_row, (n_pad - n, 1))], axis=0)
        labels = jnp.concatenate([labels, jnp.zeros((n_pad - n,), jnp.int8)], axis=0)
    # Row-major reshape: sample j -> row j//64, lanes (2*(j%64), 2*(j%64)+1).
    logits_slab = logits.reshape(n_pad // _PAIRS_PER_ROW, _LANES)
    # Labels replicated on both lanes of the pair so whichever parity the in-kernel roll
    # validates, label_j sits on the same lane as p1_j.
    labels_slab = jnp.stack([labels, labels], axis=1).reshape(
        n_pad // _PAIRS_PER_ROW, _LANES)

    idx = lambda c, i: (c * steps + i, 0)
    parts = pl.pallas_call(
        _f1_stats_kernel,
        out_shape=jax.ShapeDtypeStruct((splits * 8, _LANES), jnp.float32),
        grid_spec=pltpu.PrefetchScalarGridSpec(
            num_scalar_prefetch=0,
            grid=(splits, steps),
            in_specs=[
                pl.BlockSpec((tr, _LANES), idx),
                pl.BlockSpec((tr, _LANES), idx),
            ],
            out_specs=pl.BlockSpec((8, _LANES), lambda c, i: (c, 0)),
            scratch_shapes=[pltpu.VMEM((tr, _LANES), jnp.float32)] * 4,
        ),
        compiler_params=pltpu.CompilerParams(
            dimension_semantics=("parallel", "arbitrary"),
        ),
    )(logits_slab, labels_slab)

    # --- tiny scalar epilogue (runs once per call) ------------------------------
    parts = parts.reshape(splits, 8, _LANES)
    s1 = jnp.sum(parts[:, 0, 0])               # sum_j p1_j
    t1 = jnp.sum(parts[:, 0, 1])               # sum_j p1_j * y_j  (tp of class 1)
    l1 = jnp.sum(parts[:, 0, 2])               # sum_j y_j
    n_f = jnp.float32(n)
    # tp/fp/fn for both classes follow algebraically (p0 = 1 - p1, y0 = 1 - y1).
    tp1, fp1, fn1 = t1, s1 - t1, l1 - t1
    tp0, fp0, fn0 = n_f - l1 - s1 + t1, l1 - t1, s1 - t1

    def _f1(tp, fp, fn):
        precision = tp / (tp + fp + epsilon)
        recall = tp / (tp + fn + epsilon)
        f1 = 2.0 * precision * recall / (precision + recall + epsilon)
        return jnp.clip(f1, epsilon, 1.0 - epsilon)

    return 1.0 - 0.5 * (_f1(tp0, fp0, fn0) + _f1(tp1, fp1, fn1))


def _f1_loss_ref(y_pred, y_true, epsilon=1e-7):
    """Pure-JAX reference mirroring the PyTorch forward."""
    y_oh = jax.nn.one_hot(y_true, NUM_CLASSES, dtype=jnp.float32)
    p = jax.nn.softmax(y_pred.astype(jnp.float32), axis=1)
    tp = jnp.sum(y_oh * p, axis=0)
    fp = jnp.sum((1.0 - y_oh) * p, axis=0)
    fn = jnp.sum(y_oh * (1.0 - p), axis=0)
    precision = tp / (tp + fp + epsilon)
    recall = tp / (tp + fn + epsilon)
    f1 = 2.0 * precision * recall / (precision + recall + epsilon)
    f1 = jnp.clip(f1, epsilon, 1.0 - epsilon)
    return 1.0 - jnp.mean(f1)


if __name__ == "__main__":
    key = jax.random.PRNGKey(0)
    k1, k2, k3, k4, k5, k6 = jax.random.split(key, 6)

    # Case 1: f32 logits, ragged batch -> exercises padding (zero-contribution pad
    # rows), multi-step accumulation and the 2-way core split (grid = (2, 2)).
    n1 = 5000
    yp1 = jax.random.normal(k1, (n1, NUM_CLASSES), dtype=jnp.float32)
    yt1 = jax.random.randint(k2, (n1,), 0, NUM_CLASSES, dtype=jnp.int32)
    out1 = f1_loss(yp1, yt1, block_samples=2048)
    jax.block_until_ready(out1)
    ref1 = _f1_loss_ref(yp1, yt1)
    assert jnp.allclose(out1, ref1, atol=1e-4, rtol=1e-4), (out1, ref1)

    # Case 2: bf16 logits streamed in their native dtype, default tiling (one block),
    # called under jit to confirm there is no trace-time footgun.
    n2 = 4096
    yp2 = jax.random.normal(k3, (n2, NUM_CLASSES), dtype=jnp.float32).astype(jnp.bfloat16)
    yt2 = jax.random.randint(k4, (n2,), 0, NUM_CLASSES, dtype=jnp.int32)
    out2 = jax.jit(f1_loss)(yp2, yt2)
    jax.block_until_ready(out2)
    ref2 = _f1_loss_ref(yp2, yt2)
    assert jnp.allclose(out2, ref2, atol=1e-4, rtol=1e-4), (out2, ref2)

    # Case 3: tiny batch, heavy padding, single grid step.
    n3 = 257
    yp3 = jax.random.normal(k5, (n3, NUM_CLASSES), dtype=jnp.float32)
    yt3 = jax.random.randint(k6, (n3,), 0, NUM_CLASSES, dtype=jnp.int32)
    out3 = f1_loss(yp3, yt3)
    jax.block_until_ready(out3)
    ref3 = _f1_loss_ref(yp3, yt3)
    assert jnp.allclose(out3, ref3, atol=1e-4, rtol=1e-4), (out3, ref3)

    print("KERNEL_OK")
</pallas_src>

<mosaic_0001>
module attributes {stable_mosaic.version = 11 : i64} {
  func.func @_f1_stats_kernel(%arg0: i32, %arg1: i32, %arg2: memref<32x128xf32, #tpu.memory_space<vmem>>, %arg3: memref<32x128xi8, #tpu.memory_space<vmem>>, %arg4: memref<8x128xf32, #tpu.memory_space<vmem>>, %arg5: memref<32x128xf32, #tpu.memory_space<vmem>>, %arg6: memref<32x128xf32, #tpu.memory_space<vmem>>, %arg7: memref<32x128xf32, #tpu.memory_space<vmem>>, %arg8: memref<32x128xf32, #tpu.memory_space<vmem>>) attributes {dimension_semantics = [#tpu.dimension_semantics<parallel>, #tpu.dimension_semantics<arbitrary>], iteration_bounds = array<i64: 2, 2>, scalar_prefetch = 0 : i64, scratch_operands = 4 : i64, tpu.core_type = #tpu.core_type<tc>, window_params = [{transform_indices = @transform_0, window_bounds = array<i64: 32, 128>}, {transform_indices = @transform_1, window_bounds = array<i64: 32, 128>}, {transform_indices = @transform_2, window_bounds = array<i64: 8, 128>}]} {
    %c0_i32 = arith.constant 0 : i32
    %0 = arith.cmpi eq, %arg1, %c0_i32 : i32
    %1 = arith.extui %0 : i1 to i32
    %c0_i32_0 = arith.constant 0 : i32
    %2 = arith.cmpi ne, %1, %c0_i32_0 : i32
    scf.if %2 {
      %28 = tpu.iota {dimensions = array<i32: 1>} : vector<32x128xi32>
      %c1_i32_21 = arith.constant 1 : i32
      %29 = vector.broadcast %c1_i32_21 : i32 to vector<32x128xi32>
      %30 = arith.andi %28, %29 : vector<32x128xi32>
      %c1_i32_22 = arith.constant 1 : i32
      %31 = vector.broadcast %c1_i32_22 : i32 to vector<32x128xi32>
      %32 = arith.cmpi eq, %30, %31 : vector<32x128xi32>
      %cst_23 = arith.constant 5.000000e-01 : f32
      %cst_24 = arith.constant -5.000000e-01 : f32
      %33 = vector.broadcast %cst_23 : f32 to vector<32x128xf32>
      %34 = vector.broadcast %cst_24 : f32 to vector<32x128xf32>
      %35 = arith.select %32, %33, %34 : vector<32x128xi1>, vector<32x128xf32>
      %c0_25 = arith.constant 0 : index
      %c0_26 = arith.constant 0 : index
      %36 = vector.load %arg5[%c0_25, %c0_26] : memref<32x128xf32, #tpu.memory_space<vmem>>, vector<32x128xf32>
      tpu.vector_store %arg5[%c0_25, %c0_26], %35 {strides = array<i32>} : memref<32x128xf32, #tpu.memory_space<vmem>>, vector<32x128xf32>,
      %cst_27 = arith.constant 0.000000e+00 : f32
      %37 = vector.broadcast %cst_27 : f32 to vector<32x128xf32>
      %c0_28 = arith.constant 0 : index
      %c0_29 = arith.constant 0 : index
      %38 = vector.load %arg6[%c0_28, %c0_29] : memref<32x128xf32, #tpu.memory_space<vmem>>, vector<32x128xf32>
      tpu.vector_store %arg6[%c0_28, %c0_29], %37 {strides = array<i32>} : memref<32x128xf32, #tpu.memory_space<vmem>>, vector<32x128xf32>,
      %cst_30 = arith.constant 0.000000e+00 : f32
      %39 = vector.broadcast %cst_30 : f32 to vector<32x128xf32>
      %c0_31 = arith.constant 0 : index
      %c0_32 = arith.constant 0 : index
      %40 = vector.load %arg7[%c0_31, %c0_32] : memref<32x128xf32, #tpu.memory_space<vmem>>, vector<32x128xf32>
      tpu.vector_store %arg7[%c0_31, %c0_32], %39 {strides = array<i32>} : memref<32x128xf32, #tpu.memory_space<vmem>>, vector<32x128xf32>,
      %cst_33 = arith.constant 0.000000e+00 : f32
      %41 = vector.broadcast %cst_33 : f32 to vector<32x128xf32>
      %c0_34 = arith.constant 0 : index
      %c0_35 = arith.constant 0 : index
      %42 = vector.load %arg8[%c0_34, %c0_35] : memref<32x128xf32, #tpu.memory_space<vmem>>, vector<32x128xf32>
      tpu.vector_store %arg8[%c0_34, %c0_35], %41 {strides = array<i32>} : memref<32x128xf32, #tpu.memory_space<vmem>>, vector<32x128xf32>,
    } else {
    }
    %c0 = arith.constant 0 : index
    %c0_1 = arith.constant 0 : index
    %3 = vector.load %arg2[%c0, %c0_1] : memref<32x128xf32, #tpu.memory_space<vmem>>, vector<32x128xf32>
    %c1_i32 = arith.constant 1 : i32
    %4 = tpu.dynamic_rotate %3 by %c1_i32 dim 1 : vector<32x128xf32>, i32 -> vector<32x128xf32>
    %5 = arith.subf %3, %4 : vector<32x128xf32>
    %cst = arith.constant 5.000000e-01 : f32
    %6 = vector.broadcast %cst : f32 to vector<32x128xf32>
    %7 = arith.mulf %6, %5 : vector<32x128xf32>
    %8 = math.tanh %7 : vector<32x128xf32>
    %c0_2 = arith.constant 0 : index
    %c0_3 = arith.constant 0 : index
    %9 = vector.load %arg5[%c0_2, %c0_3] : memref<32x128xf32, #tpu.memory_space<vmem>>, vector<32x128xf32>
    %10 = arith.mulf %9, %8 : vector<32x128xf32>
    %cst_4 = arith.constant 5.000000e-01 : f32
    %11 = vector.broadcast %cst_4 : f32 to vector<32x128xf32>
    %12 = arith.addf %11, %10 : vector<32x128xf32>
    %c0_5 = arith.constant 0 : index
    %c0_6 = arith.constant 0 : index
    %13 = vector.load %arg3[%c0_5, %c0_6] : memref<32x128xi8, #tpu.memory_space<vmem>>, vector<32x128xi8>
    %14 = arith.sitofp %13 : vector<32x128xi8> to vector<32x128xf32>
    %c0_7 = arith.constant 0 : index
    %c0_8 = arith.constant 0 : index
    %15 = vector.load %arg6[%c0_7, %c0_8] : memref<32x128xf32, #tpu.memory_space<vmem>>, vector<32x128xf32>
    %16 = arith.addf %15, %12 : vector<32x128xf32>
    %c0_9 = arith.constant 0 : index
    %c0_10 = arith.constant 0 : index
    %17 = vector.load %arg6[%c0_9, %c0_10] : memref<32x128xf32, #tpu.memory_space<vmem>>, vector<32x128xf32>
    tpu.vector_store %arg6[%c0_9, %c0_10], %16 {strides = array<i32>} : memref<32x128xf32, #tpu.memory_space<vmem>>, vector<32x128xf32>,
    %c0_11 = arith.constant 0 : index
    %c0_12 = arith.constant 0 : index
    %18 = vector.load %arg7[%c0_11, %c0_12] : memref<32x128xf32, #tpu.memory_space<vmem>>, vector<32x128xf32>
    %19 = arith.mulf %12, %14 : vector<32x128xf32>
    %20 = arith.addf %18, %19 : vector<32x128xf32>
    %c0_13 = arith.constant 0 : index
    %c0_14 = arith.constant 0 : index
    %21 = vector.load %arg7[%c0_13, %c0_14] : memref<32x128xf32, #tpu.memory_space<vmem>>, vector<32x128xf32>
    tpu.vector_store %arg7[%c0_13, %c0_14], %20 {strides = array<i32>} : memref<32x128xf32, #tpu.memory_space<vmem>>, vector<32x128xf32>,
    %c0_15 = arith.constant 0 : index
    %c0_16 = arith.constant 0 : index
    %22 = vector.load %arg8[%c0_15, %c0_16] : memref<32x128xf32, #tpu.memory_space<vmem>>, vector<32x128xf32>
    %23 = arith.addf %22, %14 : vector<32x128xf32>
    %c0_17 = arith.constant 0 : index
    %c0_18 = arith.constant 0 : index
    %24 = vector.load %arg8[%c0_17, %c0_18] : memref<32x128xf32, #tpu.memory_space<vmem>>, vector<32x128xf32>
    tpu.vector_store %arg8[%c0_17, %c0_18], %23 {strides = array<i32>} : memref<32x128xf32, #tpu.memory_space<vmem>>, vector<32x128xf32>,
    %c1_i32_19 = arith.constant 1 : i32
    %25 = arith.cmpi eq, %arg1, %c1_i32_19 : i32
    %26 = arith.extui %25 : i1 to i32
    %c0_i32_20 = arith.constant 0 : i32
    %27 = arith.cmpi ne, %26, %c0_i32_20 : i32
    scf.if %27 {
      %28 = tpu.iota {dimensions = array<i32: 1>} : vector<32x128xi32>
      %c1_i32_21 = arith.constant 1 : i32
      %29 = tpu.dynamic_rotate %28 by %c1_i32_21 dim 1 : vector<32x128xi32>, i32 -> vector<32x128xi32>
      %c1_i32_22 = arith.constant 1 : i32
      %30 = vector.broadcast %c1_i32_22 : i32 to vector<32x128xi32>
      %31 = arith.andi %28, %30 : vector<32x128xi32>
      %32 = arith.subi %28, %31 : vector<32x128xi32>
      %c1_i32_23 = arith.constant 1 : i32
      %33 = vector.broadcast %c1_i32_23 : i32 to vector<32x128xi32>
      %34 = arith.andi %29, %33 : vector<32x128xi32>
      %35 = arith.subi %29, %34 : vector<32x128xi32>
      %36 = arith.cmpi eq, %32, %35 : vector<32x128xi32>
      %c0_24 = arith.constant 0 : index
      %c0_25 = arith.constant 0 : index
      %37 = vector.load %arg6[%c0_24, %c0_25] : memref<32x128xf32, #tpu.memory_space<vmem>>, vector<32x128xf32>
      %cst_26 = arith.constant 0.000000e+00 : f32
      %38 = vector.broadcast %cst_26 : f32 to vector<32x128xf32>
      %39 = arith.select %36, %37, %38 : vector<32x128xi1>, vector<32x128xf32>
      %cst_27 = arith.constant dense<0.000000e+00> : vector<128xf32>
      %40 = vector.multi_reduction <add>, %39, %cst_27 [0] : vector<32x128xf32> to vector<128xf32>
      %41 = vector.shape_cast %40 : vector<128xf32> to vector<1x128xf32>
      %cst_28 = arith.constant dense<0.000000e+00> : vector<1xf32>
      %42 = vector.multi_reduction <add>, %41, %cst_28 [1] : vector<1x128xf32> to vector<1xf32>
      %43 = vector.shape_cast %42 : vector<1xf32> to vector<1x1xf32>
      %c0_29 = arith.constant 0 : index
      %c0_30 = arith.constant 0 : index
      %44 = vector.load %arg7[%c0_29, %c0_30] : memref<32x128xf32, #tpu.memory_space<vmem>>, vector<32x128xf32>
      %cst_31 = arith.constant 0.000000e+00 : f32
      %45 = vector.broadcast %cst_31 : f32 to vector<32x128xf32>
      %46 = arith.select %36, %44, %45 : vector<32x128xi1>, vector<32x128xf32>
      %cst_32 = arith.constant dense<0.000000e+00> : vector<128xf32>
      %47 = vector.multi_reduction <add>, %46, %cst_32 [0] : vector<32x128xf32> to vector<128xf32>
      %48 = vector.shape_cast %47 : vector<128xf32> to vector<1x128xf32>
      %cst_33 = arith.constant dense<0.000000e+00> : vector<1xf32>
      %49 = vector.multi_reduction <add>, %48, %cst_33 [1] : vector<1x128xf32> to vector<1xf32>
      %50 = vector.shape_cast %49 : vector<1xf32> to vector<1x1xf32>
      %c0_34 = arith.constant 0 : index
      %c0_35 = arith.constant 0 : index
      %51 = vector.load %arg8[%c0_34, %c0_35] : memref<32x128xf32, #tpu.memory_space<vmem>>, vector<32x128xf32>
      %cst_36 = arith.constant 0.000000e+00 : f32
      %52 = vector.broadcast %cst_36 : f32 to vector<32x128xf32>
      %53 = arith.select %36, %51, %52 : vector<32x128xi1>, vector<32x128xf32>
      %cst_37 = arith.constant dense<0.000000e+00> : vector<128xf32>
      %54 = vector.multi_reduction <add>, %53, %cst_37 [0] : vector<32x128xf32> to vector<128xf32>
      %55 = vector.shape_cast %54 : vector<128xf32> to vector<1x128xf32>
      %cst_38 = arith.constant dense<0.000000e+00> : vector<1xf32>
      %56 = vector.multi_reduction <add>, %55, %cst_38 [1] : vector<1x128xf32> to vector<1xf32>
      %57 = vector.shape_cast %56 : vector<1xf32> to vector<1x1xf32>
      %58 = tpu.iota {dimensions = array<i32: 0>} : vector<8x128xi32>
      %59 = tpu.iota {dimensions = array<i32: 1>} : vector<8x128xi32>
      %cst_39 = arith.constant 0.000000e+00 : f32
      %60 = vector.broadcast %cst_39 : f32 to vector<8x128xf32>
      %c0_i32_40 = arith.constant 0 : i32
      %61 = vector.broadcast %c0_i32_40 : i32 to vector<8x128xi32>
      %62 = arith.cmpi eq, %58, %61 : vector<8x128xi32>
      %c0_i32_41 = arith.constant 0 : i32
      %63 = vector.broadcast %c0_i32_41 : i32 to vector<8x128xi32>
      %64 = arith.cmpi eq, %59, %63 : vector<8x128xi32>
      %65 = arith.andi %62, %64 : vector<8x128xi1>
      %66 = vector.shape_cast %43 : vector<1x1xf32> to vector<1x1xf32>
      %67 = vector.broadcast %66 : vector<1x1xf32> to vector<8x128xf32>
      %68 = arith.select %65, %67, %60 : vector<8x128xi1>, vector<8x128xf32>
      %c0_i32_42 = arith.constant 0 : i32
      %69 = vector.broadcast %c0_i32_42 : i32 to vector<8x128xi32>
      %70 = arith.cmpi eq, %58, %69 : vector<8x128xi32>
      %c1_i32_43 = arith.constant 1 : i32
      %71 = vector.broadcast %c1_i32_43 : i32 to vector<8x128xi32>
      %72 = arith.cmpi eq, %59, %71 : vector<8x128xi32>
      %73 = arith.andi %70, %72 : vector<8x128xi1>
      %74 = vector.shape_cast %50 : vector<1x1xf32> to vector<1x1xf32>
      %75 = vector.broadcast %74 : vector<1x1xf32> to vector<8x128xf32>
      %76 = arith.select %73, %75, %68 : vector<8x128xi1>, vector<8x128xf32>
      %c0_i32_44 = arith.constant 0 : i32
      %77 = vector.broadcast %c0_i32_44 : i32 to vector<8x128xi32>
      %78 = arith.cmpi eq, %58, %77 : vector<8x128xi32>
      %c2_i32 = arith.constant 2 : i32
      %79 = vector.broadcast %c2_i32 : i32 to vector<8x128xi32>
      %80 = arith.cmpi eq, %59, %79 : vector<8x128xi32>
      %81 = arith.andi %78, %80 : vector<8x128xi1>
      %82 = vector.shape_cast %57 : vector<1x1xf32> to vector<1x1xf32>
      %83 = vector.broadcast %82 : vector<1x1xf32> to vector<8x128xf32>
      %84 = arith.select %81, %83, %76 : vector<8x128xi1>, vector<8x128xf32>
      %c0_45 = arith.constant 0 : index
      %c0_46 = arith.constant 0 : index
      %85 = vector.load %arg4[%c0_45, %c0_46] : memref<8x128xf32, #tpu.memory_space<vmem>>, vector<8x128xf32>
      tpu.vector_store %arg4[%c0_45, %c0_46], %84 {strides = array<i32>} : memref<8x128xf32, #tpu.memory_space<vmem>>, vector<8x128xf32>,
    } else {
    }
    return
  }
  func.func @transform_0(%arg0: i32, %arg1: i32) -> (i32, i32) {
    %c2_i32 = arith.constant 2 : i32
    %0 = arith.muli %arg0, %c2_i32 : i32
    %1 = arith.addi %0, %arg1 : i32
    %c0_i32 = arith.constant 0 : i32
    %c0_i32_0 = arith.constant 0 : i32
    return %1, %c0_i32 : i32, i32
  }
  func.func @transform_1(%arg0: i32, %arg1: i32) -> (i32, i32) {
    %c2_i32 = arith.constant 2 : i32
    %0 = arith.muli %arg0, %c2_i32 : i32
    %1 = arith.addi %0, %arg1 : i32
    %c0_i32 = arith.constant 0 : i32
    %c0_i32_0 = arith.constant 0 : i32
    return %1, %c0_i32 : i32, i32
  }
  func.func @transform_2(%arg0: i32, %arg1: i32) -> (i32, i32) {
    %c0_i32 = arith.constant 0 : i32
    %c0_i32_0 = arith.constant 0 : i32
    return %arg0, %c0_i32 : i32, i32
  }
}

</mosaic_0001>

<bundles_post_ra>
// kernel: tpu_custom_call.1
= control target key start
LH: loop header
LB: loop body
LE: loop exit
PB: predicated region body
PF: predicated region fallthrough
CT: control target
= control target key end

     0   :  { %s1166_s0 = inlined_call_operand.hbm [shape: f32[128,128], index: 0, kind: input, shape index: {}]   ;;  %s1167_s1 = inlined_call_operand.hbm [shape: s8[128,128], index: 1, kind: input, shape index: {}]   ;;  %s1168_s2 = inlined_call_operand.hbm [shape: f32[16,128], index: 2, kind: output, shape index: {}]  }
   0x1   :  { %1174 = sst [smem:[#allocation21_spill]] %s1166_s0 }
   0x2   :  { %7 = vsyncpa [#allocation7], 0 }
   0x3   :  { %9 = vsyncpa [#allocation7 + $0x1], 0 }
   0x4   :  { %10 = vsyncpa [#allocation10], 0 }
   0x5   :  { %12 = vsyncpa [#allocation10 + $0x1], 0 }
   0x6   :  { %13 = vsyncpa [#allocation8], 0 }
   0x7   :  { %15 = vsyncpa [#allocation8 + $0x1], 0  ;;  %s896_s9 = smov 0   ;;  %s898_s10 = smov 0  }
   0x8   :  { %s900_s11 = smov 0   ;;  %s902_s12 = smov 0  }
   0x9   :  { %s904_s13 = smov 0   ;;  %s906_s14 = smov 0  }
   0xa   :  { %s908_s15 = smov 0   ;;  %s910_s16 = smov 0  }
   0xb   :  { %s912_s17 = smov 0   ;;  %s914_s18 = smov 0  }
   0xc   :  { %s916_s19 = smov 0  }
   0xd LB: > { %1175 = sst [smem:[#allocation15_spill]] %s850_s14  ;;  %s543_s20 = sadd.s32 4294967295, %s870_s19   ;;  %s870_s19 = sphi %s916_s19, %s21_s19   ;;  %s866_s18 = sphi %s914_s18, %s1195_s18   ;;  %s862_s17 = sphi %s912_s17, %s1194_s17   ;;  %s858_s16 = sphi %s910_s16, %s1193_s16   ;;  %s854_s15 = sphi %s908_s15, %s1192_s15   ;;  %s850_s14 = sphi %s906_s14, %s1191_s14   ;;  %s846_s13 = sphi %s904_s13, %s1200_s13   ;;  %s842_s12 = sphi %s902_s12, %s1199_s12   ;;  %s838_s11 = sphi %s900_s11, %s1198_s11   ;;  %s834_s10 = sphi %s898_s10, %s1197_s10   ;;  %s830_s9 = sphi %s896_s9, %s1196_s9  }
   0xe   : > { %1176 = sst [smem:[#allocation16_spill]] %s862_s17  ;;  %s544_s21 = sadd.s32 4294967294, %s870_s19  }
   0xf   : > { %1177 = sst [smem:[#allocation17_spill]] %s866_s18  ;;  %s30_s22 = sadd.s32 1, %s862_s17 }
  0x10   : > { %s33_s23 = sadd.s32 1, %s866_s18  ;;  %p31_p0 = scmp.ge.s32.totalorder %s30_s22, 2 }
  0x11   : > { %s545_s24 = sshll.u32 %s866_s18, 1  ;;  %s44_s26 = sadd.s32 1, %s850_s14 }
  0x12   : > { %s955_s25 = sadd.s32 %s862_s17, %s545_s24  ;;  %s1202_s22 = smov (%p31_p0, %s30_s22), 0 }
  0x13   : > { %1178 = sst [smem:[#allocation18_spill]] %s1202_s22  ;;  %s1204_s23 = smov (!%p31_p0, %s33_s23), %s866_s18 }
  0x14   : > { %p51_p1 = scmp.ne.s32.totalorder %s850_s14, %s846_s13  ;;  %p52_p2 = scmp.eq.s32.totalorder %s870_s19, 0 }
  0x15   : > { %p35_p3 = scmp.ge.s32.totalorder %s1204_s23, 2  ;;  %p57_p4 = scmp.ne.s32.totalorder %s846_s13, %s842_s12 }
  0x16   : > { %p965_p5 = por %p52_p2, %p51_p1  ;;  %p58_p6 = scmp.eq.s32.totalorder %s543_s20, 0 }
  0x17   : > { %s1206_s23 = smov (%p35_p3, %s1204_s23), 0  ;;  %s100_s29 = sadd.s32 1, %s838_s11 }
  0x18   : > { %1180 = sst [smem:[#allocation19_spill]] %s1206_s23  ;;  %p971_p7 = por %p58_p6, %p57_p4 }
  0x19   : > { %s546_s30 = sshll.u32 %s1206_s23, 1  ;;  %s97_s3 = ssub.s32 %s866_s18, %s1206_s23 }
  0x1a   : > { %s40_s4 = sadd.s32 %s546_s30, %s1202_s22  ;;  %p98_p8 = scmp.eq.s32.totalorder %s97_s3, 0 }
  0x1b   : > { %s41_s5 = ssub.s32 %s955_s25, %s40_s4  ;;  %p110_p9 = scmp.ne.s32.totalorder %s838_s11, %s834_s10 }
  0x1c   : > { %p42_p10 = scmp.eq.s32.totalorder %s41_s5, 0  ;;  %p111_p11 = scmp.eq.s32.totalorder %s543_s20, 3 }
  0x1d   : > { %s984_s6 = scalar_select %p98_p8, %s838_s11, %s100_s29  }
  0x1e   : > { %s987_s7 = scalar_select %p42_p10, %s850_s14, %s44_s26  }
  0x1f   : > { %p989_p12 = por %p111_p11, %p110_p9  ;;  %p116_p13 = scmp.ne.s32.totalorder %s834_s10, %s830_s9 }
  0x20   : > { %1182 = sst [smem:[#allocation20_spill]] %s987_s7  ;;  %p117_p0 = scmp.eq.s32.totalorder %s544_s21, 3 }
  0x21   : > { %p586_p1 = scmp.lt.s32.totalorder %s870_s19, 4  ;;  %s999_s12 = sand.u32 1, %s850_s14  }
  0x22   : > { %p1001_p2 = por %p117_p0, %p116_p13  ;;  %s551_s20 = sshll.u32 %s999_s12, 5 }
  0x23   : > { %s568_s29 = sshll.u32 %s955_s25, 9  ;;  %s1185_s0 = sld [smem:[#allocation21_spill]] }
  0x24   : > { %s141_s4 = scalar_lea.vmem [#allocation6], %s551_s20  ;;  %p1012_p3 = pnand %p586_p1, %p965_p5 }
  0x25   : > { %s150_s5 = sshll.u32 %s141_s4, 4  ;;  %s138_s23 = scalar_lea.sflag [#allocation7], %s999_s12  ;;  %s151_s5 = int_to_ptr.vmem [resolvable:$true] %s150_s5 }
  0x26   : > { %p692_p4 = pneg %p1012_p3  ;;  %s703_s22 = scalar_lea.vmem %s151_s5, 512 }
  0x27   : > { %p704_p6 = scmp.ne.s32.totalorder %s151_s5, %s703_s22 }
  0x29   : > { %s149_s3 = scalar_lea.hbm %s1185_s0, %s568_s29  ;;  %p706_p8 = pnand %p704_p6, %p692_p4 }
  0x2a   : > { %s872_s29 = smov [#allocation6]  }
  0x2b   : > { %p707_p9 = pneg %p706_p8  ;;  %s708_s20 = sshll.u32 %s872_s29, 4  ;;  %s709_s20 = int_to_ptr.vmem [resolvable:$false] %s708_s20 }
  0x2c   : > { %s710_s27 = scalar_lea.vmem %s709_s20, 1024  ;;  %p711_p5 = scmp.lt.s32.totalorder %s151_s5, %s709_s20 }
  0x2d   : > { %p712_p10 = scmp.lt.s32.totalorder %s710_s27, %s703_s22 }
  0x2f   : > { %p713_p11 = por %p712_p10, %p711_p5 }
  0x31   : > { %p714_p13 = pnand %p713_p11, %p707_p9 }
  0x33   : > { %717 = shalt.err (!%p714_p13)
}
  0x34   : > { %s873_s26 = smov 128   ;;  %s874_s30 = smov 8  }
  0x35   : > { %578 = dma.hbm_to_vmem [thread:$0]  (!%p1012_p3), %s149_s3, 512, %s151_s5, %s138_s23, %s873_s26, %s873_s26, %s874_s30  }
  0x36   : > { %p558_p0 = scmp.ge.s32.totalorder %s870_s19, 1  ;;  %p178_p1 = scmp.lt.s32.totalorder %s870_s19, 5 }
  0x37   : > { %s555_s4 = sshll.u32 %s999_s12, 3  ;;  %s557_s22 = sshll.u32 %s955_s25, 7 }
  0x38   : > { %p1027_p6 = pnand %p558_p0, %p178_p1  ;;  %s164_s20 = scalar_lea.vmem [#allocation9], %s555_s4 }
  0x39   : > { %s173_s27 = sshll.u32 %s164_s20, 4  ;;  %s171_s17 = scalar_lea.hbm %s1167_s1, %s557_s22  ;;  %s174_s27 = int_to_ptr.vmem [resolvable:$true] %s173_s27 }
  0x3a   : > { %s161_s7 = scalar_lea.sflag [#allocation10], %s999_s12  ;;  %s731_s14 = scalar_lea.vmem %s174_s27, 128 }
  0x3b   : > { %p732_p8 = scmp.ne.s32.totalorder %s174_s27, %s731_s14  ;;  %s875_s23 = smov [#allocation9]  }
  0x3c   : > { %s736_s3 = sshll.u32 %s875_s23, 4  ;;  %s737_s3 = int_to_ptr.vmem [resolvable:$false] %s736_s3 }
  0x3d   : > { %p734_p9 = pnand %p732_p8, %p692_p4  ;;  %s738_s5 = scalar_lea.vmem %s737_s3, 256 }
  0x3e   : > { %p739_p10 = scmp.lt.s32.totalorder %s174_s27, %s737_s3  ;;  %p740_p11 = scmp.lt.s32.totalorder %s738_s5, %s731_s14 }
  0x3f   : > { %p735_p5 = pneg %p734_p9 }
  0x40   : > { %p741_p13 = por %p740_p11, %p739_p10 }
  0x42   : > { %p742_p0 = pnand %p741_p13, %p735_p5 }
  0x44   : > { %745 = shalt.err (!%p742_p0)
}
  0x45   : > { %581 = dma.hbm_to_vmem [thread:$0]  (!%p1012_p3), %s171_s17, 128, %s174_s27, %s161_s7  }
  0x46   : > { %182 = sbr.rel (%p1027_p6) target bundleno = 554 (0x22a), region = 28  ;;  %s184_s0 = sand.u32 (!%p1027_p6), 1, %s846_s13  }
  0x47   : > { %s559_s18 = sshll.u32 (!%p1027_p6), %s184_s0, 5  ;;  %s185_s25 = scalar_lea.sflag (!%p1027_p6), [#allocation7], %s184_s0 }
  0x48   : > { %s1044_s12 = scalar_lea.vmem (!%p1027_p6), [#allocation6], %s559_s18 }
  0x4b   : > { %817 = dma.done.wait (%p971_p7), %s185_s25, 512  }
  0x4c   : > { %819 = vsyncadd (%p971_p7), %s185_s25, 4294966784  ;;  %s560_s14 = sshll.u32 %s184_s0, 3  ;;  %s194_s26 = scalar_lea.sflag [#allocation10], %s184_s0 }
  0x4d   : > { %s1050_s21 = scalar_lea.vmem [#allocation9], %s560_s14 }
  0x4e   : > { %821 = dma.done.wait (%p971_p7), %s194_s26, 128  }
  0x4f   : > { %823 = vsyncadd (%p971_p7), %s194_s26, 4294967168  ;;  %s220_s17 = sand.u32 1, %s834_s10   ;;  %p562_p3 = scmp.ne.s32.totalorder %s854_s15, 0 }
  0x50   : > { %s1059_s7 = sshll.u32 %s220_s17, 3 }
  0x51   : > { %s222_s30 = scalar_lea.vmem [#allocation11], %s1059_s7  ;;  %231 = sbr.rel (%p562_p3) target bundleno = 96 (0x60), region = 40 }
  0x56   : > { %v232_v0 = vlaneseq  ;;  %v876_v1 = vmov 0.0   ;;  %v877_v4 = vmov -0.5  }
  0x57   : > { %241 = vst [vmem:[#allocation3] sm:$0xff] %v876_v1  ;;  %242 = vst [vmem:[#allocation3 + $0x18] sm:$0xff] %v876_v1 }
  0x58   : > { %243 = vst [vmem:[#allocation3 + $0x8] sm:$0xff] %v876_v1  ;;  %244 = vst [vmem:[#allocation3 + $0x10] sm:$0xff] %v876_v1  ;;  %v233_v2 = vand.u32 127, %v232_v0 }
  0x59   : > { %245 = vst [vmem:[#allocation4] sm:$0xff] %v876_v1  ;;  %246 = vst [vmem:[#allocation4 + $0x8] sm:$0xff] %v876_v1 }
  0x5a   : > { %247 = vst [vmem:[#allocation4 + $0x10] sm:$0xff] %v876_v1  ;;  %248 = vst [vmem:[#allocation4 + $0x18] sm:$0xff] %v876_v1  ;;  %v234_v3 = vand.u32 1, %v233_v2 }
  0x5b   : > { %249 = vst [vmem:[#allocation5] sm:$0xff] %v876_v1  ;;  %250 = vst [vmem:[#allocation5 + $0x10] sm:$0xff] %v876_v1 }
  0x5c   : > { %251 = vst [vmem:[#allocation5 + $0x18] sm:$0xff] %v876_v1  ;;  %252 = vst [vmem:[#allocation5 + $0x8] sm:$0xff] %v876_v1  ;;  %vm235_vm0 = vcmp.eq.s32.totalorder %v234_v3, 1 }
  0x5d   : > { %v236_v5 = vsel %vm235_vm0, 0.5, %v877_v4 }
  0x5e   : > { %237 = vst [vmem:[#allocation2 + $0x10] sm:$0xff] %v236_v5  ;;  %238 = vst [vmem:[#allocation2] sm:$0xff] %v236_v5 }
  0x5f   : > { %239 = vst [vmem:[#allocation2 + $0x18] sm:$0xff] %v236_v5  ;;  %240 = vst [vmem:[#allocation2 + $0x8] sm:$0xff] %v236_v5 }
  0x60 PF: > { %v255_v6 = vld [vmem:[%s1044_s12 + $0x10] sm:$0xff]  ;;  %v253_v7 = vld [vmem:[%s1044_s12] sm:$0xff]  ;;  %s878_s28 = smov 1   ;;  %v256_v9 = vld [vmem:[%s1044_s12 + $0x18] sm:$0xff]  ;;  %p563_p7 = scmp.ne.s32.totalorder %s854_s15, 1 }
  0x61   : > { %261 = vrot.lane.b32.xlu1 %v255_v6, %s878_s28  ;;  %257 = vrot.lane.b32.xlu0 %v253_v7, %s878_s28  ;;  %v289_v8 = vld [vmem:[%s1050_s21] sm:$0xff]  ;;  %v312_v51 = vld [vmem:[#allocation4 + $0x10] sm:$0xff]  ;;  %v299_v0 = vld [vmem:[#allocation3 + $0x18] sm:$0xff]  ;;  %s879_s4 = smov (!%p563_p7), 1  }
  0x62   : > { %v254_v10 = vld [vmem:[%s1044_s12 + $0x8] sm:$0xff]  ;;  %v292_v11 = vunpack.c.2.s8 %v289_v8  ;;  %v290_v15 = vunpack.c.0.s8 %v289_v8  ;;  %v293_v16 = vunpack.c.3.s8 %v289_v8  ;;  %v291_v17 = vunpack.c.1.s8 %v289_v8  ;;  %v326_v19 = vld [vmem:[#allocation5] sm:$0xff]  ;;  %v327_v25 = vld [vmem:[#allocation5 + $0x10] sm:$0xff] }
  0x63   : > { %v328_v12 = vld [vmem:[#allocation5 + $0x18] sm:$0xff]  ;;  %v329_v22 = vld [vmem:[#allocation5 + $0x8] sm:$0xff]  ;;  %v298_v48 = vld [vmem:[#allocation3] sm:$0xff] }
  0x64   : > { %v296_v13 = vcvt.s32.f32 %v292_v11  ;;  %v294_v18 = vcvt.s32.f32 %v290_v15  ;;  %v297_v20 = vcvt.s32.f32 %v293_v16  ;;  %v295_v23 = vcvt.s32.f32 %v291_v17  ;;  %v300_v44 = vld [vmem:[#allocation3 + $0x8] sm:$0xff]  ;;  %v310_v56 = vld [vmem:[#allocation4] sm:$0xff]  ;;  %v301_v60 = vld [vmem:[#allocation3 + $0x10] sm:$0xff] }
  0x65   : > { %263 = vrot.lane.b32.xlu1 %v256_v9, %s878_s28  ;;  %259 = vrot.lane.b32.xlu0 %v254_v10, %s878_s28  ;;  %v277_v40 = vld [vmem:[#allocation2 + $0x10] sm:$0xff]  ;;  %v278_v49 = vld [vmem:[#allocation2] sm:$0xff]  ;;  %v313_v2 = vld [vmem:[#allocation4 + $0x18] sm:$0xff] }
  0x66   : > { %v332_v14 = vadd.f32 %v328_v12, %v296_v13  ;;  %v330_v21 = vadd.f32 %v326_v19, %v294_v18  ;;  %v333_v24 = vadd.f32 %v329_v22, %v297_v20  ;;  %v331_v26 = vadd.f32 %v327_v25, %v295_v23  ;;  %v279_v39 = vld [vmem:[#allocation2 + $0x18] sm:$0xff]  ;;  %v280_v46 = vld [vmem:[#allocation2 + $0x8] sm:$0xff] }
  0x68   : > { %336 = vst [vmem:[#allocation5 + $0x18] sm:$0xff] %v332_v14  ;;  %334 = vst [vmem:[#allocation5] sm:$0xff] %v330_v21 }
  0x69   : > { %337 = vst [vmem:[#allocation5 + $0x8] sm:$0xff] %v333_v24  ;;  %335 = vst [vmem:[#allocation5 + $0x10] sm:$0xff] %v331_v26 }
  0xd3   : > { %v262_v27 = vpop.permute.xlu1 %261  ;;  %v258_v28 = vpop.permute.xlu0 %257 }
  0xd4   : > { %v267_v29 = vsub.f32 %v255_v6, %v262_v27  ;;  %v265_v30 = vsub.f32 %v253_v7, %v258_v28  ;;  %v311_v6 = vld [vmem:[#allocation4 + $0x8] sm:$0xff] }
  0xd6   : > { %v271_v31 = vmul.f32 0.5, %v267_v29  ;;  %v269_v32 = vmul.f32 0.5, %v265_v30 }
  0xd7   : > { %v264_v33 = vpop.permute.xlu1 %263  ;;  %v260_v34 = vpop.permute.xlu0 %259 }
  0xd8   : > { %682 = vtanh.f32 %v271_v31  ;;  %v268_v35 = vsub.f32 %v256_v9, %v264_v33  ;;  %v266_v36 = vsub.f32 %v254_v10, %v260_v34 }
  0xd9   : > { %684 = vtanh.f32 %v269_v32 }
  0xda   : > { %v272_v37 = vmul.f32 0.5, %v268_v35  ;;  %v270_v38 = vmul.f32 0.5, %v266_v36 }
  0xdc   : > { %686 = vtanh.f32 %v272_v37 }
  0xdd   : > { %688 = vtanh.f32 %v270_v38 }
  0xe5   : > { %v683_v41 = vpop.eup %682 }
  0xe6   : > { %v685_v42 = vpop.eup %684  ;;  %v283_v43 = vmul.f32 %v683_v41, %v279_v39 }
  0xe7   : > { %v281_v45 = vmul.f32 %v685_v42, %v277_v40 }
  0xe8   : > { %v287_v47 = vadd.f32 0.5, %v283_v43 }
  0xe9   : > { %v687_v50 = vpop.eup %686  ;;  %v285_v52 = vadd.f32 0.5, %v281_v45 }
  0xea   : > { %v689_v53 = vpop.eup %688  ;;  %v304_v54 = vadd.f32 %v300_v44, %v287_v47  ;;  %v316_v55 = vmul.f32 %v296_v13, %v287_v47  ;;  %v284_v57 = vmul.f32 %v687_v50, %v280_v46 }
  0xeb   : > { %v302_v58 = vadd.f32 %v298_v48, %v285_v52  ;;  %v314_v59 = vmul.f32 %v294_v18, %v285_v52  ;;  %v282_v61 = vmul.f32 %v689_v53, %v278_v49 }
  0xec   : > { %308 = vst [vmem:[#allocation3 + $0x8] sm:$0xff] %v304_v54  ;;  %v320_v62 = vadd.f32 %v316_v55, %v312_v51  ;;  %v288_v63 = vadd.f32 0.5, %v284_v57 }
  0xed   : > { %306 = vst [vmem:[#allocation3] sm:$0xff] %v302_v58  ;;  %v318_v1 = vadd.f32 %v314_v59, %v310_v56  ;;  %v286_v3 = vadd.f32 0.5, %v282_v61 }
  0xee   : > { %324 = vst [vmem:[#allocation4 + $0x10] sm:$0xff] %v320_v62  ;;  %v305_v4 = vadd.f32 %v301_v60, %v288_v63  ;;  %v317_v5 = vmul.f32 %v297_v20, %v288_v63 }
  0xef   : > { %322 = vst [vmem:[#allocation4] sm:$0xff] %v318_v1  ;;  %v303_v7 = vadd.f32 %v299_v0, %v286_v3  ;;  %v315_v8 = vmul.f32 %v295_v23, %v286_v3  ;;  %341 = sbr.rel (%p563_p7) target bundleno = 531 (0x213), region = 44 }
  0xf0   : > { %309 = vst [vmem:[#allocation3 + $0x10] sm:$0xff] %v305_v4  ;;  %v321_v9 = vadd.f32 %v317_v5, %v313_v2 }
  0xf1   : > { %307 = vst [vmem:[#allocation3 + $0x18] sm:$0xff] %v303_v7  ;;  %v319_v10 = vadd.f32 %v315_v8, %v311_v6 }
  0xf2   : > { %325 = vst [vmem:[#allocation4 + $0x18] sm:$0xff] %v321_v9 }
  0xf3   : > { %323 = vst [vmem:[#allocation4 + $0x8] sm:$0xff] %v319_v10 }
  0xf4   : > { %v342_v11 = vlaneseq  ;;  %v351_v20 = vld [vmem:[#allocation3] sm:$0xff]  ;;  %v390_v25 = vld [vmem:[#allocation5 + $0x10] sm:$0xff]  ;;  %v353_v28 = vld [vmem:[#allocation3 + $0x8] sm:$0xff] }
  0xf5   : > { %v372_v23 = vld [vmem:[#allocation4 + $0x10] sm:$0xff]  ;;  %v389_v24 = vld [vmem:[#allocation5] sm:$0xff]  ;;  %v391_v33 = vld [vmem:[#allocation5 + $0x18] sm:$0xff] }
  0xf6   : > { %v1070_v12 = vand.u32 127, %v342_v11  ;;  %v370_v18 = vld [vmem:[#allocation4] sm:$0xff]  ;;  %v392_v41 = vld [vmem:[#allocation5 + $0x8] sm:$0xff]  ;;  %v409_v6 = vshrl.u32 %v342_v11, 7 }
  0xf7   : > { %v354_v35 = vld [vmem:[#allocation3 + $0x10] sm:$0xff] }
  0xf8   : > { %344 = vrot.lane.b32.xlu0 %v1070_v12, %s879_s4  ;;  %v346_v13 = vand.u32 1, %v1070_v12  ;;  %v352_v21 = vld [vmem:[#allocation3 + $0x18] sm:$0xff]  ;;  %vm410_vm2 = vcmp.eq.s32.totalorder %v409_v6, 0  ;;  %vm411_vm3 = vcmp.eq.s32.totalorder %v1070_v12, 0  ;;  %vm414_vm4 = vcmp.eq.s32.totalorder %v1070_v12, 1 }
  0xf9   : > { %v373_v29 = vld [vmem:[#allocation4 + $0x18] sm:$0xff]  ;;  %vm412_vm5 = vmand %vm410_vm2, %vm411_vm3  ;;  %vm417_vm6 = vcmp.eq.s32.totalorder %v1070_v12, 2 }
  0xfa   : > { %v347_v15 = vsub.s32 %v1070_v12, %v346_v13  ;;  %v371_v19 = vld [vmem:[#allocation4 + $0x8] sm:$0xff]  ;;  %vm415_vm7 = vmand %vm410_vm2, %vm414_vm4 }
  0xfb   : > { %vm418_vm8 = vmand %vm410_vm2, %vm417_vm6 }
 0x16a   : > { %v345_v14 = vpop.permute.xlu0 %344 }
 0x16b   : > { %v348_v16 = vand.u32 1, %v345_v14 }
 0x16d   : > { %v349_v17 = vsub.s32 %v345_v14, %v348_v16 }
 0x16f   : > { %vm1075_vm1 = vcmp.eq.s32.totalorder %v347_v15, %v349_v17 }
 0x170   : > { %v374_v26 = vsel %vm1075_vm1, %v370_v18, 0.0  ;;  %v375_v27 = vsel %vm1075_vm1, %v371_v19, 0.0  ;;  %v355_v31 = vsel %vm1075_vm1, %v351_v20, 0.0  ;;  %v356_v32 = vsel %vm1075_vm1, %v352_v21, 0.0 }
 0x171   : > { %v378_v30 = vadd.f32 %v375_v27, %v374_v26  ;;  %v376_v34 = vsel %vm1075_vm1, %v372_v23, 0.0  ;;  %v359_v36 = vadd.f32 %v356_v32, %v355_v31  ;;  %v393_v37 = vsel %vm1075_vm1, %v389_v24, 0.0 }
 0x172   : > { %v394_v38 = vsel %vm1075_vm1, %v390_v25, 0.0  ;;  %v357_v40 = vsel %vm1075_vm1, %v353_v28, 0.0  ;;  %v377_v43 = vsel %vm1075_vm1, %v373_v29, 0.0  ;;  %v395_v45 = vsel %vm1075_vm1, %v391_v33, 0.0 }
 0x173   : > { %v379_v39 = vadd.f32 %v378_v30, %v376_v34  ;;  %v397_v42 = vadd.f32 %v394_v38, %v393_v37  ;;  %v360_v44 = vadd.f32 %v359_v36, %v357_v40  ;;  %v358_v47 = vsel %vm1075_vm1, %v354_v35, 0.0 }
 0x174   : > { %v396_v50 = vsel %vm1075_vm1, %v392_v41, 0.0 }
 0x175   : > { %v380_v46 = vadd.f32 %v379_v39, %v377_v43  ;;  %v398_v48 = vadd.f32 %v397_v42, %v395_v45  ;;  %v361_v49 = vadd.f32 %v360_v44, %v358_v47 }
 0x177   : > { %v381_v51 = vrot.slane %v380_v46, 4  ;;  %v399_v52 = vadd.f32 %v398_v48, %v396_v50  ;;  %v362_v53 = vrot.slane %v361_v49, 4 }
 0x179   : > { %v382_v54 = vadd.f32 %v381_v51, %v380_v46  ;;  %v400_v55 = vrot.slane %v399_v52, 4  ;;  %v363_v56 = vadd.f32 %v362_v53, %v361_v49 }
 0x17b   : > { %v383_v57 = vrot.slane %v382_v54, 2  ;;  %v401_v58 = vadd.f32 %v400_v55, %v399_v52  ;;  %v364_v59 = vrot.slane %v363_v56, 2 }
 0x17d   : > { %v384_v60 = vadd.f32 %v383_v57, %v382_v54  ;;  %v402_v61 = vrot.slane %v401_v58, 2  ;;  %v365_v62 = vadd.f32 %v364_v59, %v363_v56 }
 0x17f   : > { %v385_v63 = vrot.slane %v384_v60, 1  ;;  %v403_v0 = vadd.f32 %v402_v61, %v401_v58  ;;  %v366_v1 = vrot.slane %v365_v62, 1 }
 0x181   : > { %v386_v2 = vadd.f32 %v385_v63, %v384_v60  ;;  %v404_v3 = vrot.slane %v403_v0, 1  ;;  %v367_v4 = vadd.f32 %v366_v1, %v365_v62 }
 0x183   : > { %387 = vadd.xlane.f32.xlu1 %v386_v2  ;;  %368 = vadd.xlane.f32.xlu0 %v367_v4  ;;  %v405_v5 = vadd.f32 %v404_v3, %v403_v0 }
 0x187   : > { %406 = vadd.xlane.f32.xlu1 %v405_v5 }
 0x20c   : > { %v388_v7 = vpop.xlane.xlu1 %387  ;;  %v369_v8 = vpop.xlane.xlu0 %368 }
 0x20d   : > { %v413_v9 = vsel %vm412_vm5, %v369_v8, 0.0 }
 0x20e   : > { %v416_v10 = vsel %vm415_vm7, %v388_v7, %v413_v9 }
 0x210   : > { %v407_v13 = vpop.xlane.xlu1 %406 }
 0x211   : > { %v419_v14 = vsel %vm418_vm8, %v407_v13, %v416_v10 }
 0x212   : > { %420 = vst [vmem:[%s222_s30] sm:$0xff] %v419_v14 }
 0x213 PF: > { %s565_s15 = sshll.u32 %s858_s16, 7  ;;  %s435_s27 = sshll.u32 %s222_s30, 4  ;;  %s436_s27 = int_to_ptr.vmem [resolvable:$true] %s435_s27 }
 0x214   : > { %s433_s20 = scalar_lea.hbm %s1168_s2, %s565_s15  ;;  %s422_s23 = scalar_lea.sflag [#allocation8], %s220_s17 }
 0x215   : > { %s746_s3 = scalar_lea.vmem %s436_s27, 128  ;;  %s880_s5 = smov [#allocation11]  }
 0x216   : > { %p747_p4 = scmp.ne.s32.totalorder %s436_s27, %s746_s3  ;;  %s750_s0 = sshll.u32 %s880_s5, 4  ;;  %s751_s0 = int_to_ptr.vmem [resolvable:$false] %s750_s0 }
 0x217   : > { %s752_s18 = scalar_lea.vmem %s751_s0, 256  ;;  %p753_p8 = scmp.lt.s32.totalorder %s436_s27, %s751_s0 }
 0x218   : > { %p748_p1 = pnand %p747_p4, %p989_p12  ;;  %p754_p9 = scmp.lt.s32.totalorder %s752_s18, %s746_s3 }
 0x21a   : > { %p749_p6 = pneg %p748_p1  ;;  %p755_p5 = por %p754_p9, %p753_p8 }
 0x21c   : > { %p756_p10 = pnand %p755_p5, %p749_p6 }
 0x21e   : > { %759 = shalt.err (!%p756_p10)
}
 0x21f   : > { %s760_s16 = scalar_lea.hbm %s433_s20, 128  ;;  %s764_s14 = scalar_lea.hbm %s1168_s2, 256 }
 0x220   : > { %p761_p11 = scmp.ne.s32.totalorder %s433_s20, %s760_s16  ;;  %p765_p3 = scmp.lt.s32.totalorder %s433_s20, %s1168_s2 }
 0x221   : > { %p766_p7 = scmp.lt.s32.totalorder %s764_s14, %s760_s16 }
 0x222   : > { %p762_p13 = pnand %p761_p11, %p989_p12 }
 0x223   : > { %p767_p4 = por %p766_p7, %p765_p3 }
 0x224   : > { %p763_p0 = pneg %p762_p13 }
 0x226   : > { %p768_p1 = pnand %p767_p4, %p763_p0 }
 0x228   : > { %771 = shalt.err (!%p768_p1)
}
 0x229   : > { %573 = dma.vmem_to_hbm [thread:$0]  (%p989_p12), %s436_s27, 128, %s433_s20, %s422_s23  }
 0x22a PF: > { %p587_p6 = scmp.ge.s32.totalorder %s870_s19, 2  ;;  %s447_s17 = sand.u32 1, %s830_s9  }
 0x22b   : > { %s448_s7 = scalar_lea.sflag [#allocation8], %s447_s17 }
 0x22c   : > { %p583_p8 = pnand %p587_p6, %p1001_p2 }
 0x22e   : > { %p584_p9 = pneg %p583_p8 }
 0x230   : > { %825 = dma.done.wait (%p584_p9), %s448_s7, 128  }
 0x231   : > { %827 = vsyncadd (%p584_p9), %s448_s7, 4294967168  ;;  %s21_s19 = sadd.s32 1, %s870_s19   ;;  %s1190_s8 = sld [smem:[#allocation15_spill]] }
 0x232   : > { %p18_p5 = scmp.ge.s32.totalorder %s21_s19, 6   ;;  %s1191_s14 = sld [smem:[#allocation20_spill]] }
 0x233   : > { %s1192_s15 = sld [smem:[#allocation16_spill]]  ;;  %s1196_s9 = smov %s834_s10 }
 0x234   : > { %s1193_s16 = sld [smem:[#allocation17_spill]]  ;;  %s1197_s10 = smov %s838_s11 }
 0x235   : > { %s1194_s17 = sld [smem:[#allocation18_spill]]  ;;  %s1198_s11 = smov %s984_s6 }
 0x236   : > { %s1195_s18 = sld [smem:[#allocation19_spill]]  ;;  %s1199_s12 = smov %s846_s13 }
 0x237   : > { %s1200_s13 = smov %s1190_s8  ;;  %20 = sbr.rel (!%p18_p5) target bundleno = 13 (0xd), region = 94 }
 0x23c   :  { %453 = vsyncpa [#allocation7], 1 }
 0x23d   :  { %455 = vsyncpa [#allocation7 + $0x1], 1 }
 0x23e   :  { %456 = vsyncpa [#allocation10], 1 }
 0x23f   :  { %458 = vsyncpa [#allocation10 + $0x1], 1 }
 0x240   :  { %459 = vsyncpa [#allocation8], 1 }
 0x241   :  { %461 = vsyncpa [#allocation8 + $0x1], 1 }

</bundles_post_ra>
